<compile_context>
chip_gen: v7x
topology: tpu7x:2x2x1
jax: 0.10.0
libtpu: 0.0.40
codegen_flags: <defaults>
</compile_context>

<pallas_src>
import functools

import jax
import jax.numpy as jnp
from jax import lax
from jax.experimental import pallas as pl
from jax.experimental.pallas import tpu as pltpu

LEAKY_SLOPE = 0.01          # PyTorch nn.LeakyReLU default
LANE = 128                  # lane-dense slab width
_SELECT_MAX_CLASSES = 8     # VPU select-chain lookup up to this many classes
_MAX_BATCH_TILE = 512       # rows per grid step; sized for v7x's 64 MiB VMEM too


def _leaky_relu(x):
    return jnp.where(x >= 0, x, LEAKY_SLOPE * x)


def _round_up(x, m):
    return (x + m - 1) // m * m


def fold_params(emb, w1, b1, w2, b2, wmu, bmu, wlv, blv):
    """Constant-fold the whole AME 'dis' network into an f32 lookup table.

    forward(idx) is a deterministic function of a finite discrete input, so
    heads_table[c] = [mu(c) | logvar(c)], computed once in f32 at pack time,
    reproduces the module's forward exactly for every class c.
    Weights are given as (in, out) == torch_weight.T, biases as (1, out).
    Returns a lane-dense (round_up(class_num, 8), 128*) f32 slab.
    """
    class_num, oup = emb.shape
    em_dim = wmu.shape[1]
    h = _leaky_relu(emb @ w1 + b1.reshape(1, -1))
    h = _leaky_relu(h @ w2 + b2.reshape(1, -1))
    mu = h @ wmu + bmu.reshape(1, -1)
    lv = h @ wlv + blv.reshape(1, -1)
    heads = jnp.concatenate([mu, lv], axis=1)              # (class_num, 2*em_dim)

    rows = _round_up(class_num, 8)
    width = _round_up(2 * em_dim, LANE)
    table = jnp.zeros((rows, width), jnp.float32)
    table = table.at[:class_num, : 2 * em_dim].set(heads.astype(jnp.float32))
    return table


def ame_kernel(idx_ref, tab_ref, eps_ref, out_ref, *, class_num, em_dim):
    """Per batch tile: f32 table-row lookup + reparameterization (VPU/EUP only)."""
    tb = idx_ref.shape[0]
    two_em = 2 * em_dim
    idx = idx_ref[...]                                      # (tb, 1) int32

    if class_num <= _SELECT_MAX_CLASSES:
        # f32 VPU select chain (no MXU, no bf16 -> also optimal on v5e).
        # Out-of-range indices fall back to class 0 (torch.nn.Embedding raises).
        heads = jnp.broadcast_to(tab_ref[0:1, 0:two_em], (tb, two_em))
        for c in range(1, class_num):
            row = tab_ref[c:c + 1, 0:two_em]                # (1, 2*em_dim) f32
            heads = jnp.where(idx == c, row, heads)         # (tb, 2*em_dim) f32
    else:
        # One-hot gather on the MXU for larger class_num.
        iota = lax.broadcasted_iota(jnp.int32, (tb, class_num), 1)
        onehot = (iota == idx).astype(jnp.float32)
        heads = jnp.dot(onehot, tab_ref[0:class_num, 0:two_em],
                        preferred_element_type=jnp.float32)

    # Reparameterization: z = mu + eps * 0.5 * exp(logvar)   (AME.sampling).
    mu = heads[:, 0:em_dim]
    lv = heads[:, em_dim:two_em]
    z = mu + eps_ref[...] * (0.5 * jnp.exp(lv))

    # Direct stores into the lane-padded (tb, 128) output slab [mu | lv | z];
    # pad lanes [3*em_dim:128) are never read by the wrapper.
    out_ref[:, 0:two_em] = heads
    out_ref[:, two_em:two_em + em_dim] = z


def ame_forward(idx, table, eps, *, class_num, em_dim):
    """Runs the folded-AME kernel; returns (mu, logvar, z), each (B, em_dim) f32."""
    B = idx.shape[0]
    out_w = _round_up(3 * em_dim, LANE)

    tb = min(_round_up(B, 8), _MAX_BATCH_TILE)              # 8-aligned batch tile
    Bp = _round_up(B, tb)

    idx2d = jnp.zeros((Bp, 1), jnp.int32).at[:B, 0].set(idx.astype(jnp.int32))
    eps_p = jnp.zeros((Bp, em_dim), jnp.float32).at[:B, :].set(
        eps.astype(jnp.float32))

    rows, width = table.shape
    grid = (Bp // tb,)

    out = pl.pallas_call(
        functools.partial(ame_kernel, class_num=class_num, em_dim=em_dim),
        out_shape=jax.ShapeDtypeStruct((Bp, out_w), jnp.float32),
        grid_spec=pltpu.PrefetchScalarGridSpec(
            num_scalar_prefetch=0,
            grid=grid,
            in_specs=[
                pl.BlockSpec((tb, 1), lambda i: (i, 0)),         # class indices
                pl.BlockSpec((rows, width), lambda i: (0, 0)),   # table: VMEM-resident
                pl.BlockSpec((tb, em_dim), lambda i: (i, 0)),    # eps
            ],
            out_specs=pl.BlockSpec((tb, out_w), lambda i: (i, 0)),
        ),
        compiler_params=pltpu.CompilerParams(
            # Batch tiles are independent: megacore on v6e, both TCs on v7x.
            dimension_semantics=("parallel",)),
    )(idx2d, table, eps_p)

    mu = out[:B, 0:em_dim]
    lv = out[:B, em_dim:2 * em_dim]
    z = out[:B, 2 * em_dim:3 * em_dim]
    return mu, lv, z


def _init_params(key, class_num, oup, em_dim):
    ks = jax.random.split(key, 9)

    def lin(kw, kb, fan_in, fan_out):
        bound = 1.0 / jnp.sqrt(fan_in)
        # weight stored as (in, out) == torch_weight.T
        w = jax.random.uniform(kw, (fan_in, fan_out), jnp.float32, -bound, bound)
        b = jax.random.uniform(kb, (1, fan_out), jnp.float32, -bound, bound)
        return w, b

    emb = jax.random.normal(ks[0], (class_num, oup), jnp.float32)  # nn.Embedding ~ N(0,1)
    w1, b1 = lin(ks[1], ks[2], oup, oup)
    w2, b2 = lin(ks[3], ks[4], oup, oup)
    wmu, bmu = lin(ks[5], ks[6], oup, em_dim)
    wlv, blv = lin(ks[7], ks[8], oup, em_dim)
    return emb, w1, b1, w2, b2, wmu, bmu, wlv, blv


def _ref_forward(idx, emb, w1, b1, w2, b2, wmu, bmu, wlv, blv, eps):
    """Pure-JAX f32 reference mirroring the PyTorch module."""
    x = emb[idx]
    h = _leaky_relu(x @ w1 + b1)
    h = _leaky_relu(h @ w2 + b2)
    mu = h @ wmu + bmu
    lv = h @ wlv + blv
    z = mu + eps * 0.5 * jnp.exp(lv)    # sigma = 0.5 * exp(logvar), per AME.sampling
    return mu, lv, z


if __name__ == "__main__":
    B, class_num, oup, em_dim = 8, 2, 16, 32

    key = jax.random.PRNGKey(0)
    k_param, k_idx, k_eps = jax.random.split(key, 3)

    params = _init_params(k_param, class_num, oup, em_dim)
    idx = jax.random.randint(k_idx, (B,), 0, class_num, dtype=jnp.int32)
    eps = jax.random.normal(k_eps, (B, em_dim), jnp.float32)

    table = fold_params(*params)
    mu, lv, z = ame_forward(idx, table, eps, class_num=class_num, em_dim=em_dim)
    jax.block_until_ready((mu, lv, z))

    mu_r, lv_r, z_r = _ref_forward(idx, *params, eps)

    # All math is f32 (fold done in f32 at pack time) -> tight tolerances.
    assert jnp.allclose(mu, mu_r, atol=1e-3, rtol=1e-3), "mu mismatch"
    assert jnp.allclose(lv, lv_r, atol=1e-3, rtol=1e-3), "logvar mismatch"
    assert jnp.allclose(z, mu + eps * 0.5 * jnp.exp(lv), atol=1e-5, rtol=1e-5), \
        "z reparameterization mismatch"
    assert jnp.allclose(z, z_r, atol=1e-3, rtol=1e-3), "z mismatch"

    print("KERNEL_OK")
</pallas_src>

<mosaic_0001>
module attributes {stable_mosaic.version = 11 : i64} {
  func.func @ame_kernel(%arg0: i32, %arg1: memref<8x1xi32, #tpu.memory_space<vmem>>, %arg2: memref<8x128xf32, #tpu.memory_space<vmem>>, %arg3: memref<8x32xf32, #tpu.memory_space<vmem>>, %arg4: memref<8x128xf32, #tpu.memory_space<vmem>>) attributes {dimension_semantics = [#tpu.dimension_semantics<parallel>], iteration_bounds = array<i64: 1>, scalar_prefetch = 0 : i64, scratch_operands = 0 : i64, tpu.core_type = #tpu.core_type<tc>, window_params = [{transform_indices = @transform_0, window_bounds = array<i64: 8, 1>}, {pipeline_mode = #tpu.pipeline_mode<synchronous>, transform_indices = @transform_1, window_bounds = array<i64: 8, 128>}, {transform_indices = @transform_2, window_bounds = array<i64: 8, 32>}, {transform_indices = @transform_3, window_bounds = array<i64: 8, 128>}]} {
    %c0 = arith.constant 0 : index
    %c0_0 = arith.constant 0 : index
    %0 = vector.load %arg1[%c0, %c0_0] : memref<8x1xi32, #tpu.memory_space<vmem>>, vector<8x1xi32>
    %c0_1 = arith.constant 0 : index
    %c0_2 = arith.constant 0 : index
    %1 = vector.load %arg2[%c0_1, %c0_2] : memref<8x128xf32, #tpu.memory_space<vmem>>, vector<1x64xf32>
    %2 = vector.shape_cast %1 : vector<1x64xf32> to vector<1x64xf32>
    %3 = vector.broadcast %2 : vector<1x64xf32> to vector<8x64xf32>
    %c1 = arith.constant 1 : index
    %c0_3 = arith.constant 0 : index
    %4 = vector.load %arg2[%c1, %c0_3] : memref<8x128xf32, #tpu.memory_space<vmem>>, vector<1x64xf32>
    %c1_i32 = arith.constant 1 : i32
    %5 = vector.broadcast %c1_i32 : i32 to vector<8x1xi32>
    %6 = arith.cmpi eq, %0, %5 : vector<8x1xi32>
    %7 = vector.shape_cast %6 : vector<8x1xi1> to vector<8x1xi1>
    %8 = vector.broadcast %7 : vector<8x1xi1> to vector<8x64xi1>
    %9 = vector.shape_cast %4 : vector<1x64xf32> to vector<1x64xf32>
    %10 = vector.broadcast %9 : vector<1x64xf32> to vector<8x64xf32>
    %11 = arith.select %8, %10, %3 : vector<8x64xi1>, vector<8x64xf32>
    %12 = vector.extract_strided_slice %11 {offsets = [0, 0], sizes = [8, 32], strides = [1, 1]} : vector<8x64xf32> to vector<8x32xf32>
    %13 = vector.extract_strided_slice %11 {offsets = [0, 32], sizes = [8, 32], strides = [1, 1]} : vector<8x64xf32> to vector<8x32xf32>
    %c0_4 = arith.constant 0 : index
    %c0_5 = arith.constant 0 : index
    %14 = vector.load %arg3[%c0_4, %c0_5] : memref<8x32xf32, #tpu.memory_space<vmem>>, vector<8x32xf32>
    %15 = math.exp %13 : vector<8x32xf32>
    %cst = arith.constant 5.000000e-01 : f32
    %16 = vector.broadcast %cst : f32 to vector<8x32xf32>
    %17 = arith.mulf %16, %15 : vector<8x32xf32>
    %18 = arith.mulf %14, %17 : vector<8x32xf32>
    %19 = arith.addf %12, %18 : vector<8x32xf32>
    %c0_6 = arith.constant 0 : index
    %c0_7 = arith.constant 0 : index
    %20 = vector.load %arg4[%c0_6, %c0_7] : memref<8x128xf32, #tpu.memory_space<vmem>>, vector<8x64xf32>
    tpu.vector_store %arg4[%c0_6, %c0_7], %11 {strides = array<i32>} : memref<8x128xf32, #tpu.memory_space<vmem>>, vector<8x64xf32>,
    %c0_8 = arith.constant 0 : index
    %c64 = arith.constant 64 : index
    %21 = vector.load %arg4[%c0_8, %c64] : memref<8x128xf32, #tpu.memory_space<vmem>>, vector<8x32xf32>
    tpu.vector_store %arg4[%c0_8, %c64], %19 {strides = array<i32>} : memref<8x128xf32, #tpu.memory_space<vmem>>, vector<8x32xf32>,
    return
  }
  func.func @transform_0(%arg0: i32) -> (i32, i32) {
    %c0_i32 = arith.constant 0 : i32
    %c0_i32_0 = arith.constant 0 : i32
    return %arg0, %c0_i32 : i32, i32
  }
  func.func @transform_1(%arg0: i32) -> (i32, i32) {
    %c0_i32 = arith.constant 0 : i32
    %c0_i32_0 = arith.constant 0 : i32
    %c0_i32_1 = arith.constant 0 : i32
    return %c0_i32, %c0_i32_0 : i32, i32
  }
  func.func @transform_2(%arg0: i32) -> (i32, i32) {
    %c0_i32 = arith.constant 0 : i32
    %c0_i32_0 = arith.constant 0 : i32
    return %arg0, %c0_i32 : i32, i32
  }
  func.func @transform_3(%arg0: i32) -> (i32, i32) {
    %c0_i32 = arith.constant 0 : i32
    %c0_i32_0 = arith.constant 0 : i32
    return %arg0, %c0_i32 : i32, i32
  }
}

</mosaic_0001>

<bundles_post_ra>
// kernel: tpu_custom_call.1
= control target key start
LH: loop header
LB: loop body
LE: loop exit
PB: predicated region body
PF: predicated region fallthrough
CT: control target
= control target key end

     0   :  { %v98_v1 = vmov 0   ;;  %s146_s0 = inlined_call_operand.vmem [shape: s32[8,1], index: 0, kind: input, shape index: {}]   ;;  %s147_s1 = inlined_call_operand.vmem [shape: f32[8,128], index: 1, kind: input, shape index: {}]   ;;  %s148_s2 = inlined_call_operand.vmem [shape: f32[8,32], index: 2, kind: input, shape index: {}]   ;;  %s149_s3 = inlined_call_operand.hbm [shape: f32[8,128], index: 3, kind: output, shape index: {}]  }
   0x1   :  { %v15_v0 = vld [vmem:[%s146_s0] sm:$0xff]  ;;  %71 = vset.pattern.permute.xlu0 %v98_v1 }
   0x2   :  { %vm22_vm0 = vcmp.eq.s32.totalorder %v15_v0, 1 }
   0x3   :  { %8 = vsyncpa [#allocation3], 0  ;;  %v23_v2 = vsel %vm22_vm0, 1, %v98_v1  ;;  %v65_v3 = vld [vmem:[%s147_s1] ss:$0 sm:$0xff]  ;;  %vm43_vm1 = vcmask 523264  }
   0x4   :  { %25 = vperm.xlu0 %71, %v23_v2   ;;  %v66_v4 = vld [vmem:[%s147_s1 + $0x1] ss:$0 sm:$0xff]  ;;  %s99_s0 = smov 96   ;;  %s100_s20 = smov 64   ;;  %vm49_vm3 = vcmask 785920  }
   0x5   :  { %v33_v10 = vld [vmem:[%s148_s2] sm:$0xff]  ;;  %s101_s1 = smov [#allocation2]  }
   0x6   :  { %s57_s21 = sshll.u32 %s101_s1, 4  ;;  %s58_s21 = int_to_ptr.vmem [resolvable:$true] %s57_s21 }
   0x7   :  { %s74_s22 = scalar_lea.vmem %s58_s21, 128  ;;  %p79_p1 = scmp.lt.s32.totalorder %s58_s21, %s58_s21 }
   0x8   :  { %p75_p0 = scmp.ne.s32.totalorder %s58_s21, %s74_s22  ;;  %p80_p2 = scmp.lt.s32.totalorder %s74_s22, %s74_s22 }
   0xa   :  { %p81_p3 = por %p80_p2, %p79_p1 }
   0xc   :  { %p82_p4 = pnand %p81_p3, %p75_p0 }
  0x83   :  { %v26_v5 = vpop.permute.xlu0 %25 }
  0x84   :  { %vm27_vm2 = vcmp.eq.s32.totalorder %v26_v5, 1 }
  0x85   :  { %v32_v6 = vsel %vm27_vm2, %v66_v4, %v65_v3 }
  0x86   :  { %v34_v7 = vmul.f32 1.442695, %v32_v6  ;;  %44 = vst.msk [vmem:[#allocation2] sm:$0xff] %vm43_vm1, %v32_v6 }
  0x88   :  { %72 = vpow2.f32 %v34_v7 }
  0x92   :  { %v73_v8 = vpop.eup %72 }
  0x93   :  { %v36_v9 = vmul.f32 0.5, %v73_v8 }
  0x95   :  { %38 = vrot.lane.b32.xlu0 %v36_v9, %s99_s0 }
 0x107   :  { %v39_v11 = vpop.permute.xlu0 %38 }
 0x108   :  { %v41_v12 = vmul.f32 %v39_v11, %v33_v10 }
 0x10a   :  { %v42_v13 = vadd.f32 %v41_v12, %v32_v6 }
 0x10c   :  { %46 = vrot.lane.b32.xlu1 %v42_v13, %s100_s20 }
 0x17e   :  { %v47_v14 = vpop.permute.xlu1 %46 }
 0x17f   :  { %50 = vst.msk [vmem:[#allocation2] sm:$0xff] %vm49_vm3, %v47_v14 }
 0x180   :  { %85 = shalt.err (!%p82_p4)
}
 0x181   :  { %s86_s24 = scalar_lea.hbm %s149_s3, 128 }
 0x182   :  { %p87_p5 = scmp.ne.s32.totalorder %s149_s3, %s86_s24  ;;  %p90_p6 = scmp.lt.u32.totalorder %s86_s24, %s149_s3 }
 0x184   :  { %p92_p7 = pnand %p90_p6, %p87_p5 }
 0x186   :  { %95 = shalt.err (!%p92_p7)
}
 0x187   :  { %60 = dma.vmem_to_hbm [thread:$0]  %s58_s21, 128, %s149_s3, [#allocation3]  }
 0x188   :  { %96 = dma.done.wait [#allocation3], 128  }
 0x189   :  { %97 = vsyncadd [#allocation3], 4294967168 }
 0x18a   :  { %64 = vsyncpa [#allocation3], 1 }

</bundles_post_ra>
